<compile_context>
chip_gen: v6e
topology: v6e:2x2x1
jax: 0.10.0
libtpu: 0.0.40
codegen_flags: <defaults>
</compile_context>

<pallas_src>
import functools

import jax
import jax.numpy as jnp
from jax.experimental import pallas as pl
from jax.experimental.pallas import tpu as pltpu

_LANE = 128
_SUBLANE = 8
_MAX_SPATIAL_TILE = 16 * 1024          # reduction-axis tile size (elements)
_TARGET_TILE_BYTES = 4 * 1024 * 1024   # per in-flight input tile (x2 double-buffered)
_MAX_ROW_TILE = 2048


def _round_up(x, m):
    return ((x + m - 1) // m) * m


def _gap_kernel(x_ref, o_ref, acc_ref, *, inv_spatial, spatial_tile, spatial,
                mask_tail):
    # x_ref  : (TR, TS) input tile
    # o_ref  : (TR, 1)  per-row mean (written once, at the last spatial step)
    # acc_ref: (TR, 1)  f32 running sum, resident across the spatial grid axis
    k = pl.program_id(1)

    @pl.when(k == 0)
    def _init():
        acc_ref[...] = jnp.zeros_like(acc_ref)

    x = x_ref[...].astype(jnp.float32)
    if mask_tail:
        # The last spatial tile may run past H*W; zero out-of-range lanes so
        # they do not contribute to the sum.
        col = k * spatial_tile + jax.lax.broadcasted_iota(jnp.int32, x.shape, 1)
        x = jnp.where(col < spatial, x, 0.0)
    acc_ref[...] += jnp.sum(x, axis=-1, keepdims=True)

    @pl.when(k == pl.num_programs(1) - 1)
    def _finalize():
        o_ref[...] = (acc_ref[...] * inv_spatial).astype(o_ref.dtype)


def global_avg_pool_2d(x, *, row_tile=None, spatial_tile=None):
    """(N, C, H, W) -> (N, C, 1, 1), averaging over H and W (keeps input dtype)."""
    n, c, h, w = x.shape
    rows = n * c
    spatial = h * w
    x2d = x.reshape(rows, spatial)
    itemsize = x2d.dtype.itemsize

    # --- spatial (reduction-axis) tile ------------------------------------
    if spatial_tile is None:
        ts = min(spatial, _MAX_SPATIAL_TILE)
    else:
        ts = spatial_tile
    if ts < spatial:
        ts = _round_up(ts, _LANE)      # non-full-extent blocks need 128-lane alignment
    if ts >= spatial:
        ts = spatial                   # single reduction step, full-extent block

    # --- row tile: fill ~4 MiB per tile (~8 MiB double-buffered) -----------
    if row_tile is None:
        ts_lanes = _round_up(ts, _LANE)            # account for VMEM lane padding
        tr = _TARGET_TILE_BYTES // (ts_lanes * itemsize)
    else:
        tr = row_tile
    tr = min(tr, _MAX_ROW_TILE, _round_up(rows, _SUBLANE))
    tr = max(_SUBLANE, (tr // _SUBLANE) * _SUBLANE)

    grid = (pl.cdiv(rows, tr), pl.cdiv(spatial, ts))
    mask_tail = (spatial % ts) != 0

    kernel = functools.partial(
        _gap_kernel,
        inv_spatial=1.0 / float(spatial),
        spatial_tile=ts,
        spatial=spatial,
        mask_tail=mask_tail,
    )

    out2d = pl.pallas_call(
        kernel,
        out_shape=jax.ShapeDtypeStruct((rows, 1), x.dtype),
        grid_spec=pltpu.PrefetchScalarGridSpec(
            num_scalar_prefetch=0,
            grid=grid,
            in_specs=[pl.BlockSpec((tr, ts), lambda i, k: (i, k))],
            out_specs=pl.BlockSpec((tr, 1), lambda i, k: (i, 0)),
            scratch_shapes=[pltpu.VMEM((tr, 1), jnp.float32)],
        ),
        compiler_params=pltpu.CompilerParams(
            dimension_semantics=("parallel", "arbitrary"),
            vmem_limit_bytes=32 * 1024 * 1024,
        ),
        cost_estimate=pl.CostEstimate(
            flops=rows * spatial,
            transcendentals=0,
            bytes_accessed=rows * spatial * itemsize + rows * itemsize,
        ),
    )(x2d)

    return out2d.reshape(n, c, 1, 1)


if __name__ == "__main__":
    # 1) Basic small NCHW feature map.
    x = jax.random.normal(jax.random.PRNGKey(0), (2, 4, 16, 16), dtype=jnp.float32)
    out = jax.block_until_ready(global_avg_pool_2d(x))
    ref = jnp.mean(x, axis=(2, 3), keepdims=True)
    assert out.shape == (2, 4, 1, 1), out.shape
    assert jnp.allclose(out, ref, atol=1e-5, rtol=1e-5), "mismatch (basic)"

    # 2) Rows not a multiple of 8 / spatial not lane aligned (partial edge blocks).
    x2 = jax.random.normal(jax.random.PRNGKey(1), (3, 5, 7, 7), dtype=jnp.float32)
    out2 = jax.block_until_ready(global_avg_pool_2d(x2))
    ref2 = jnp.mean(x2, axis=(2, 3), keepdims=True)
    assert out2.shape == (3, 5, 1, 1), out2.shape
    assert jnp.allclose(out2, ref2, atol=1e-5, rtol=1e-5), "mismatch (ragged rows)"

    # 3) Force the spatial-accumulator path (2 reduction steps + tail mask).
    x3 = jax.random.normal(jax.random.PRNGKey(2), (2, 3, 12, 12), dtype=jnp.float32)
    out3 = jax.block_until_ready(
        global_avg_pool_2d(x3, row_tile=8, spatial_tile=128))
    ref3 = jnp.mean(x3, axis=(2, 3), keepdims=True)
    assert jnp.allclose(out3, ref3, atol=1e-5, rtol=1e-5), "mismatch (spatial tiling)"

    # 4) bf16 activations stay bf16 end-to-end (f32 accumulation in-kernel).
    xb = jax.random.normal(jax.random.PRNGKey(3), (2, 4, 16, 16), dtype=jnp.bfloat16)
    outb = jax.block_until_ready(global_avg_pool_2d(xb))
    refb = jnp.mean(xb.astype(jnp.float32), axis=(2, 3), keepdims=True)
    assert outb.dtype == jnp.bfloat16
    assert jnp.allclose(outb.astype(jnp.float32), refb, atol=1e-2, rtol=1e-2), \
        "mismatch (bf16)"

    print("KERNEL_OK")
</pallas_src>

<mosaic_0001>
module attributes {stable_mosaic.version = 11 : i64} {
  func.func @_gap_kernel(%arg0: i32, %arg1: i32, %arg2: memref<8x256xf32, #tpu.memory_space<vmem>>, %arg3: memref<8x1xf32, #tpu.memory_space<vmem>>, %arg4: memref<8x1xf32, #tpu.memory_space<vmem>>) attributes {dimension_semantics = [#tpu.dimension_semantics<parallel>, #tpu.dimension_semantics<arbitrary>], iteration_bounds = array<i64: 1, 1>, scalar_prefetch = 0 : i64, scratch_operands = 1 : i64, tpu.core_type = #tpu.core_type<tc>, window_params = [{transform_indices = @transform_0, window_bounds = array<i64: 8, 256>}, {transform_indices = @transform_1, window_bounds = array<i64: 8, 1>}]} {
    %c0_i32 = arith.constant 0 : i32
    %0 = arith.cmpi eq, %arg1, %c0_i32 : i32
    %1 = arith.extui %0 : i1 to i32
    %c0_i32_0 = arith.constant 0 : i32
    %2 = arith.cmpi ne, %1, %c0_i32_0 : i32
    scf.if %2 {
      %cst_8 = arith.constant 0.000000e+00 : f32
      %12 = vector.broadcast %cst_8 : f32 to vector<8x1xf32>
      %c0_9 = arith.constant 0 : index
      %c0_10 = arith.constant 0 : index
      %13 = vector.load %arg4[%c0_9, %c0_10] : memref<8x1xf32, #tpu.memory_space<vmem>>, vector<8x1xf32>
      tpu.vector_store %arg4[%c0_9, %c0_10], %12 {strides = array<i32>} : memref<8x1xf32, #tpu.memory_space<vmem>>, vector<8x1xf32>,
    } else {
    }
    %c0 = arith.constant 0 : index
    %c0_1 = arith.constant 0 : index
    %3 = vector.load %arg2[%c0, %c0_1] : memref<8x256xf32, #tpu.memory_space<vmem>>, vector<8x256xf32>
    %c0_2 = arith.constant 0 : index
    %c0_3 = arith.constant 0 : index
    %4 = vector.load %arg4[%c0_2, %c0_3] : memref<8x1xf32, #tpu.memory_space<vmem>>, vector<8x1xf32>
    %cst = arith.constant dense<0.000000e+00> : vector<8xf32>
    %5 = vector.multi_reduction <add>, %3, %cst [1] : vector<8x256xf32> to vector<8xf32>
    %6 = vector.shape_cast %5 : vector<8xf32> to vector<8x1xf32>
    %7 = arith.addf %4, %6 : vector<8x1xf32>
    %c0_4 = arith.constant 0 : index
    %c0_5 = arith.constant 0 : index
    %8 = vector.load %arg4[%c0_4, %c0_5] : memref<8x1xf32, #tpu.memory_space<vmem>>, vector<8x1xf32>
    tpu.vector_store %arg4[%c0_4, %c0_5], %7 {strides = array<i32>} : memref<8x1xf32, #tpu.memory_space<vmem>>, vector<8x1xf32>,
    %c0_i32_6 = arith.constant 0 : i32
    %9 = arith.cmpi eq, %arg1, %c0_i32_6 : i32
    %10 = arith.extui %9 : i1 to i32
    %c0_i32_7 = arith.constant 0 : i32
    %11 = arith.cmpi ne, %10, %c0_i32_7 : i32
    scf.if %11 {
      %c0_8 = arith.constant 0 : index
      %c0_9 = arith.constant 0 : index
      %12 = vector.load %arg4[%c0_8, %c0_9] : memref<8x1xf32, #tpu.memory_space<vmem>>, vector<8x1xf32>
      %cst_10 = arith.constant 3.906250e-03 : f32
      %13 = vector.broadcast %cst_10 : f32 to vector<8x1xf32>
      %14 = arith.mulf %12, %13 : vector<8x1xf32>
      %c0_11 = arith.constant 0 : index
      %c0_12 = arith.constant 0 : index
      %15 = vector.load %arg3[%c0_11, %c0_12] : memref<8x1xf32, #tpu.memory_space<vmem>>, vector<8x1xf32>
      tpu.vector_store %arg3[%c0_11, %c0_12], %14 {strides = array<i32>} : memref<8x1xf32, #tpu.memory_space<vmem>>, vector<8x1xf32>,
    } else {
    }
    return
  }
  func.func @transform_0(%arg0: i32, %arg1: i32) -> (i32, i32) {
    %c0_i32 = arith.constant 0 : i32
    return %arg0, %arg1 : i32, i32
  }
  func.func @transform_1(%arg0: i32, %arg1: i32) -> (i32, i32) {
    %c0_i32 = arith.constant 0 : i32
    %c0_i32_0 = arith.constant 0 : i32
    return %arg0, %c0_i32 : i32, i32
  }
}

</mosaic_0001>

<bundles_post_ra>
// kernel: tpu_custom_call.1
= control target key start
LH: loop header
LB: loop body
LE: loop exit
PB: predicated region body
PF: predicated region fallthrough
CT: control target
= control target key end

     0   :  { %6 = vsyncpa [#allocation4], 0  ;;  %s70_s6 = smov [#allocation3]   ;;  %s88_s0 = inlined_call_operand.hbm [shape: f32[8,256], index: 0, kind: input, shape index: {}]   ;;  %s89_s1 = inlined_call_operand.vmem [shape: f32[8,1], index: 1, kind: output, shape index: {}]  }
   0x1   :  { %s13_s7 = sshll.u32 %s70_s6, 4  ;;  %s14_s7 = int_to_ptr.vmem [resolvable:$true] %s13_s7 }
   0x2   :  { %s56_s8 = scalar_lea.vmem %s14_s7, 256  ;;  %p61_p1 = scmp.lt.s32.totalorder %s14_s7, %s14_s7 }
   0x3   :  { %p57_p0 = scmp.ne.s32.totalorder %s14_s7, %s56_s8  ;;  %p62_p2 = scmp.lt.s32.totalorder %s56_s8, %s56_s8 }
   0x5   :  { %p63_p3 = por %p62_p2, %p61_p1 }
   0x7   :  { %p64_p4 = pnand %p63_p3, %p57_p0 }
   0x9   :  { %67 = shalt.err (!%p64_p4)
}
   0xa   :  { %16 = dma.hbm_to_vmem [thread:$0]  %s88_s0, 256, %s14_s7, [#allocation4]  }
   0xb   :  { %68 = dma.done.wait [#allocation4], 256  }
   0xc   :  { %69 = vsyncadd [#allocation4], 4294967040  ;;  %vm24_vm0 = vcmask 7168   ;;  %v71_v0 = vmov 0.0   ;;  %v26_v1 = vld [vmem:[#allocation3] sm:$0xff]  ;;  %v27_v2 = vld [vmem:[#allocation3 + $0x8] sm:$0xff] }
   0xd   :  { %25 = vst.msk [vmem:[#allocation2] sm:$0xff] %vm24_vm0, %v71_v0  ;;  %v29_v3 = vadd.f32 %v27_v2, %v26_v1 }
   0xf   :  { %30 = vadd.xlane.f32.xlu0 %v29_v3 }
  0x14   :  { %v28_v4 = vld [vmem:[#allocation2] sm:$0xff] }
  0x98   :  { %v31_v5 = vpop.xlane.xlu0 %30 }
  0x99   :  { %v32_v6 = vadd.f32 %v31_v5, %v28_v4 }
  0x9b   :  { %34 = vst.msk [vmem:[#allocation2] sm:$0xff] %vm24_vm0, %v32_v6 }
  0xa2   :  { %v38_v7 = vld [vmem:[#allocation2] sm:$0xff] }
  0xa3   :  { %v39_v8 = vmul.f32 0.00390625, %v38_v7 }
  0xa5   :  { %40 = vst.msk [vmem:[%s89_s1] sm:$0xff] %vm24_vm0, %v39_v8 }
  0xa6   :  { %45 = vsyncpa [#allocation4], 1 }

</bundles_post_ra>
